<compile_context>
chip_gen: v5e
topology: v5e:2x2
jax: 0.10.0
libtpu: 0.0.40
codegen_flags: <defaults>
</compile_context>

<pallas_src>
import numpy as np
import jax
import jax.numpy as jnp
from jax.experimental import pallas as pl
from jax.experimental.pallas import tpu as pltpu


def _projection_head_kernel(x_ref, w1_ref, b1_ref, w2_ref, b2_ref, o_ref):
    # x_ref:  (TB, IN)   activation tile (streams over the grid)
    # w1_ref: (IN, HID)  W1^T with BN1 scale folded in (resident)
    # b1_ref: (1, HID)   BN1 shift
    # w2_ref: (HID, OUT) W2^T with BN2 scale folded in (resident)
    # b2_ref: (1, OUT)   BN2 shift
    # o_ref:  (TB, OUT)  lane-dense output tile
    h = jnp.dot(x_ref[...], w1_ref[...], preferred_element_type=jnp.float32)
    h = jnp.maximum(h + b1_ref[...], 0.0)            # BN1 shift + ReLU
    y = jnp.dot(h.astype(w2_ref.dtype), w2_ref[...],
                preferred_element_type=jnp.float32)
    o_ref[...] = (y + b2_ref[...]).astype(o_ref.dtype)  # BN2 shift


def projection_head(x,
                    w1, gamma1, beta1, mean1, var1,
                    w2, gamma2, beta2, mean2, var2,
                    *, eps=1e-5, block_b=256):
    """Forward pass of ProjectionHead (head_type='nonlinear'), eval-mode BN.

    x:  (B, in_features)
    w1: (hidden_features, in_features)   -- nn.Linear.weight layout
    w2: (out_features, hidden_features)
    gamma/beta/mean/var: BatchNorm1d affine params + running statistics.
    """
    B, IN = x.shape
    HID = w1.shape[0]
    OUT = w2.shape[0]
    assert w1.shape == (HID, IN) and w2.shape == (OUT, HID)

    # Fold eval-mode BatchNorm1d: bn(z) = z * s + b,
    #   s = gamma / sqrt(var + eps),  b = beta - mean * s.
    inv1 = (gamma1 * jax.lax.rsqrt(var1.astype(jnp.float32) + eps)).astype(jnp.float32)
    b1 = (beta1 - mean1 * inv1).reshape(1, HID).astype(jnp.float32)
    inv2 = (gamma2 * jax.lax.rsqrt(var2.astype(jnp.float32) + eps)).astype(jnp.float32)
    b2 = (beta2 - mean2 * inv2).reshape(1, OUT).astype(jnp.float32)

    # Pre-transpose weights and fold the BN scale into the columns (one-time
    # XLA ops on the resident operands, not on the activation stream):
    #   (x @ W^T) * s  ==  x @ (W^T * s)
    w1ts = (jnp.asarray(w1, jnp.float32).T * inv1.reshape(1, HID))   # (IN, HID)
    w2ts = (jnp.asarray(w2, jnp.float32).T * inv2.reshape(1, OUT))   # (HID, OUT)

    # Batch tile: multiple of 8 sublanes; pad the batch so it divides evenly.
    # (Zero-padded rows are independent under eval-mode BN and sliced off.)
    tb = int(min(block_b, max(B, 8)))
    tb = max(8, (tb // 8) * 8)
    n_b = pl.cdiv(B, tb)
    Bp = n_b * tb
    xp = x if Bp == B else jnp.pad(x, ((0, Bp - B), (0, 0)))

    # VMEM budget: double-buffered activation stream + resident weights/shifts.
    itm = jnp.dtype(x.dtype).itemsize
    vmem_bytes = (2 * tb * (IN + OUT) * itm
                  + 2 * 4 * (IN * HID + HID * OUT + HID + OUT))
    vmem_limit = int(min(64 * 1024 * 1024,       # v7x physical VMEM per TC
                         max(16 * 1024 * 1024, int(vmem_bytes * 1.25) + (2 << 20))))

    out = pl.pallas_call(
        _projection_head_kernel,
        out_shape=jax.ShapeDtypeStruct((Bp, OUT), x.dtype),
        grid_spec=pltpu.PrefetchScalarGridSpec(
            num_scalar_prefetch=0,
            grid=(n_b,),
            in_specs=[
                pl.BlockSpec((tb, IN), lambda i: (i, 0)),    # x tile (streams)
                pl.BlockSpec((IN, HID), lambda i: (0, 0)),   # W1^T * s1 (resident)
                pl.BlockSpec((1, HID), lambda i: (0, 0)),    # BN1 shift
                pl.BlockSpec((HID, OUT), lambda i: (0, 0)),  # W2^T * s2 (resident)
                pl.BlockSpec((1, OUT), lambda i: (0, 0)),    # BN2 shift
            ],
            out_specs=pl.BlockSpec((tb, OUT), lambda i: (i, 0)),
        ),
        compiler_params=pltpu.CompilerParams(
            dimension_semantics=("parallel",),   # v7x: shard batch tiles on 2 TCs
            vmem_limit_bytes=vmem_limit,
        ),
    )(xp, w1ts, b1, w2ts, b2)
    return out[:B]


def _reference(x, w1, g1, be1, m1, v1, w2, g2, be2, m2, v2, eps=1e-5):
    """Pure-numpy reference mirroring the torch forward (eval-mode BN)."""
    x = np.asarray(x, np.float32)
    h = x @ np.asarray(w1, np.float32).T
    h = (h - m1) / np.sqrt(v1 + eps) * g1 + be1
    h = np.maximum(h, 0.0)
    y = h @ np.asarray(w2, np.float32).T
    y = (y - m2) / np.sqrt(v2 + eps) * g2 + be2
    return y


if __name__ == "__main__":
    key = jax.random.PRNGKey(0)
    B, IN, HID, OUT = 32, 128, 256, 128
    ks = jax.random.split(key, 11)

    x = jax.random.normal(ks[0], (B, IN), dtype=jnp.float32)
    w1 = jax.random.normal(ks[1], (HID, IN), dtype=jnp.float32) / np.sqrt(IN)
    gamma1 = jax.random.uniform(ks[2], (HID,), jnp.float32, 0.5, 1.5)
    beta1 = 0.1 * jax.random.normal(ks[3], (HID,), dtype=jnp.float32)
    mean1 = 0.1 * jax.random.normal(ks[4], (HID,), dtype=jnp.float32)
    var1 = jax.random.uniform(ks[5], (HID,), jnp.float32, 0.5, 1.5)
    w2 = jax.random.normal(ks[6], (OUT, HID), dtype=jnp.float32) / np.sqrt(HID)
    gamma2 = jax.random.uniform(ks[7], (OUT,), jnp.float32, 0.5, 1.5)
    beta2 = 0.1 * jax.random.normal(ks[8], (OUT,), dtype=jnp.float32)
    mean2 = 0.1 * jax.random.normal(ks[9], (OUT,), dtype=jnp.float32)
    var2 = jax.random.uniform(ks[10], (OUT,), jnp.float32, 0.5, 1.5)

    # block_b=8 -> grid=(4,) even at this small test size, exercising the
    # pipelined / parallel grid path.
    out = projection_head(x, w1, gamma1, beta1, mean1, var1,
                          w2, gamma2, beta2, mean2, var2, block_b=8)
    out = jax.block_until_ready(out)

    ref = _reference(np.asarray(x), np.asarray(w1), np.asarray(gamma1),
                     np.asarray(beta1), np.asarray(mean1), np.asarray(var1),
                     np.asarray(w2), np.asarray(gamma2), np.asarray(beta2),
                     np.asarray(mean2), np.asarray(var2))
    np.testing.assert_allclose(np.asarray(out), ref, rtol=2e-2, atol=2e-2)
    print("KERNEL_OK")
</pallas_src>

<mosaic_0001>
module attributes {stable_mosaic.version = 11 : i64} {
  func.func @_projection_head_kernel(%arg0: i32, %arg1: memref<8x128xf32, #tpu.memory_space<vmem>>, %arg2: memref<128x256xf32, #tpu.memory_space<vmem>>, %arg3: memref<1x256xf32, #tpu.memory_space<vmem>>, %arg4: memref<256x128xf32, #tpu.memory_space<vmem>>, %arg5: memref<1x128xf32, #tpu.memory_space<vmem>>, %arg6: memref<8x128xf32, #tpu.memory_space<vmem>>) attributes {dimension_semantics = [#tpu.dimension_semantics<parallel>], iteration_bounds = array<i64: 4>, scalar_prefetch = 0 : i64, scratch_operands = 0 : i64, tpu.core_type = #tpu.core_type<tc>, window_params = [{transform_indices = @transform_0, window_bounds = array<i64: 8, 128>}, {pipeline_mode = #tpu.pipeline_mode<synchronous>, transform_indices = @transform_1, window_bounds = array<i64: 128, 256>}, {pipeline_mode = #tpu.pipeline_mode<synchronous>, transform_indices = @transform_2, window_bounds = array<i64: 1, 256>}, {pipeline_mode = #tpu.pipeline_mode<synchronous>, transform_indices = @transform_3, window_bounds = array<i64: 256, 128>}, {pipeline_mode = #tpu.pipeline_mode<synchronous>, transform_indices = @transform_4, window_bounds = array<i64: 1, 128>}, {transform_indices = @transform_5, window_bounds = array<i64: 8, 128>}]} {
    %c0 = arith.constant 0 : index
    %c0_0 = arith.constant 0 : index
    %0 = vector.load %arg1[%c0, %c0_0] : memref<8x128xf32, #tpu.memory_space<vmem>>, vector<8x128xf32>
    %c0_1 = arith.constant 0 : index
    %c0_2 = arith.constant 0 : index
    %1 = vector.load %arg2[%c0_1, %c0_2] : memref<128x256xf32, #tpu.memory_space<vmem>>, vector<128x256xf32>
    %cst = arith.constant dense<0.000000e+00> : vector<8x256xf32>
    %2 = tpu.matmul %0, %1, %cst {dimension_numbers = #tpu.dot_dimension_numbers<[1], [0], [0], [1], [0, 0, 1, 1], [], []>} : vector<8x128xf32>, vector<128x256xf32>, vector<8x256xf32> -> vector<8x256xf32>
    %c0_3 = arith.constant 0 : index
    %c0_4 = arith.constant 0 : index
    %3 = vector.load %arg3[%c0_3, %c0_4] : memref<1x256xf32, #tpu.memory_space<vmem>>, vector<1x256xf32>
    %4 = vector.broadcast %3 : vector<1x256xf32> to vector<8x256xf32>
    %5 = arith.addf %2, %4 : vector<8x256xf32>
    %cst_5 = arith.constant 0.000000e+00 : f32
    %6 = vector.broadcast %cst_5 : f32 to vector<8x256xf32>
    %7 = arith.maximumf %5, %6 : vector<8x256xf32>
    %c0_6 = arith.constant 0 : index
    %c0_7 = arith.constant 0 : index
    %8 = vector.load %arg4[%c0_6, %c0_7] : memref<256x128xf32, #tpu.memory_space<vmem>>, vector<256x128xf32>
    %cst_8 = arith.constant dense<0.000000e+00> : vector<8x128xf32>
    %9 = tpu.matmul %7, %8, %cst_8 {dimension_numbers = #tpu.dot_dimension_numbers<[1], [0], [0], [1], [0, 0, 1, 1], [], []>} : vector<8x256xf32>, vector<256x128xf32>, vector<8x128xf32> -> vector<8x128xf32>
    %c0_9 = arith.constant 0 : index
    %c0_10 = arith.constant 0 : index
    %10 = vector.load %arg5[%c0_9, %c0_10] : memref<1x128xf32, #tpu.memory_space<vmem>>, vector<1x128xf32>
    %11 = vector.broadcast %10 : vector<1x128xf32> to vector<8x128xf32>
    %12 = arith.addf %9, %11 : vector<8x128xf32>
    %c0_11 = arith.constant 0 : index
    %c0_12 = arith.constant 0 : index
    %13 = vector.load %arg6[%c0_11, %c0_12] : memref<8x128xf32, #tpu.memory_space<vmem>>, vector<8x128xf32>
    tpu.vector_store %arg6[%c0_11, %c0_12], %12 {strides = array<i32>} : memref<8x128xf32, #tpu.memory_space<vmem>>, vector<8x128xf32>,
    return
  }
  func.func @transform_0(%arg0: i32) -> (i32, i32) {
    %c0_i32 = arith.constant 0 : i32
    %c0_i32_0 = arith.constant 0 : i32
    return %arg0, %c0_i32 : i32, i32
  }
  func.func @transform_1(%arg0: i32) -> (i32, i32) {
    %c0_i32 = arith.constant 0 : i32
    %c0_i32_0 = arith.constant 0 : i32
    %c0_i32_1 = arith.constant 0 : i32
    return %c0_i32, %c0_i32_0 : i32, i32
  }
  func.func @transform_2(%arg0: i32) -> (i32, i32) {
    %c0_i32 = arith.constant 0 : i32
    %c0_i32_0 = arith.constant 0 : i32
    %c0_i32_1 = arith.constant 0 : i32
    return %c0_i32, %c0_i32_0 : i32, i32
  }
  func.func @transform_3(%arg0: i32) -> (i32, i32) {
    %c0_i32 = arith.constant 0 : i32
    %c0_i32_0 = arith.constant 0 : i32
    %c0_i32_1 = arith.constant 0 : i32
    return %c0_i32, %c0_i32_0 : i32, i32
  }
  func.func @transform_4(%arg0: i32) -> (i32, i32) {
    %c0_i32 = arith.constant 0 : i32
    %c0_i32_0 = arith.constant 0 : i32
    %c0_i32_1 = arith.constant 0 : i32
    return %c0_i32, %c0_i32_0 : i32, i32
  }
  func.func @transform_5(%arg0: i32) -> (i32, i32) {
    %c0_i32 = arith.constant 0 : i32
    %c0_i32_0 = arith.constant 0 : i32
    return %arg0, %c0_i32 : i32, i32
  }
}

</mosaic_0001>

<bundles_post_ra>
// kernel: tpu_custom_call.1
= control target key start
LH: loop header
LB: loop body
LE: loop exit
PB: predicated region body
PF: predicated region fallthrough
CT: control target
= control target key end

     0   :  { %10 = vsyncpa [#allocation3], 0  ;;  %s1060_s0 = inlined_call_operand.hbm [shape: f32[32,128], index: 0, kind: input, shape index: {}]   ;;  %s1061_s1 = inlined_call_operand.hbm [shape: f32[128,256], index: 1, kind: input, shape index: {}]   ;;  %s1062_s2 = inlined_call_operand.hbm [shape: f32[1,256], index: 2, kind: input, shape index: {}]   ;;  %s1063_s3 = inlined_call_operand.hbm [shape: f32[256,128], index: 3, kind: input, shape index: {}]   ;;  %s1064_s4 = inlined_call_operand.vmem [shape: f32[1,128], index: 4, kind: input, shape index: {}]   ;;  %s1065_s5 = inlined_call_operand.hbm [shape: f32[32,128], index: 5, kind: output, shape index: {}]  }
   0x1   :  { %12 = vsyncpa [#allocation3 + $0x1], 0 }
   0x2   :  { %13 = vsyncpa [#allocation6], 0 }
   0x3   :  { %14 = vsyncpa [#allocation9], 0 }
   0x4   :  { %15 = vsyncpa [#allocation4], 0 }
   0x5   :  { %17 = vsyncpa [#allocation4 + $0x1], 0  ;;  %s896_s18 = smov 0   ;;  %s898_s19 = smov 0  }
   0x6   :  { %s900_s20 = smov 0   ;;  %s902_s21 = smov 0  }
   0x7 LB: > { %s175_s24 = sshll.u32 %s1061_s1, 4  ;;  %s920_s25 = sadd.s32 4294967295, %s857_s21   ;;  %s857_s21 = sphi %s902_s21, %s1075_s21   ;;  %s853_s20 = sphi %s900_s20, %s1074_s20   ;;  %s849_s19 = sphi %s898_s19, %s1073_s19   ;;  %s845_s18 = sphi %s896_s18, %s1072_s18   ;;  %s176_s24 = int_to_ptr.hbm [resolvable:$true] %s175_s24 }
   0x8   : > { %p564_p0 = scmp.ge.s32.totalorder %s857_s21, 1  ;;  %p44_p1 = scmp.eq.s32.totalorder %s920_s25, 0 }
   0x9   : > { %p164_p2 = scmp.lt.s32.totalorder %s857_s21, 5  ;;  %s859_s27 = smov [#allocation5]  }
   0xa   : > { %s177_s28 = sshll.u32 %s859_s27, 4  ;;  %s190_s6 = sshll.u32 %s1062_s2, 4  ;;  %s178_s28 = int_to_ptr.vmem [resolvable:$true] %s177_s28  ;;  %s191_s6 = int_to_ptr.hbm [resolvable:$true] %s190_s6 }
   0xb   : > { %p925_p3 = pnand %p564_p0, %p164_p2  ;;  %s201_s10 = sshll.u32 %s1063_s3, 4  ;;  %s202_s10 = int_to_ptr.hbm [resolvable:$true] %s201_s10 }
   0xc   : > { %s860_s11 = smov [#allocation7]   ;;  %s861_s13 = smov 256  }
   0xd   : > { %p597_p4 = pneg %p925_p3  ;;  %s192_s12 = sshll.u32 %s860_s11, 4  ;;  %s193_s12 = int_to_ptr.vmem [resolvable:$true] %s192_s12 }
   0xe   : > { %s862_s14 = smov 16   ;;  %s863_s15 = smov [#allocation8]  }
   0xf   : > { %p936_p5 = pnand %p597_p4, %p44_p1  ;;  %s203_s16 = sshll.u32 %s863_s15, 4  ;;  %s204_s16 = int_to_ptr.vmem [resolvable:$true] %s203_s16 }
  0x10   : > { %s864_s17 = smov 128   ;;  %s865_s22 = smov 8  }
  0x11   : > { %600 = dma.hbm_to_vmem [thread:$0]  (!%p936_p5), %s176_s24, 4096, %s178_s28, [#allocation6], %s861_s13, %s861_s13, %s862_s14  }
  0x12   : > { %603 = dma.hbm_to_vmem [thread:$0]  (!%p936_p5), %s191_s6, 32, %s193_s12, [#allocation6]  }
  0x13   : > { %606 = dma.hbm_to_vmem [thread:$0]  (!%p936_p5), %s202_s10, 4096, %s204_s16, [#allocation9], %s864_s17, %s864_s17, %s865_s22  }
  0x14   : > { %s563_s23 = sadd.s32 4294967294, %s857_s21   ;;  %s951_s24 = sadd.s32 1, %s857_s21  }
  0x15   : > { %s30_s27 = sadd.s32 1, %s853_s20  ;;  %s27_s28 = ssub.s32 %s857_s21, %s951_s24 }
  0x16   : > { %p37_p6 = scmp.ne.s32.totalorder %s853_s20, %s849_s19  ;;  %p28_p7 = scmp.eq.s32.totalorder %s27_s28, 0 }
  0x17   : > { %p38_p8 = scmp.eq.s32.totalorder %s857_s21, 0  ;;  %p43_p9 = scmp.ne.s32.totalorder %s849_s19, %s845_s18 }
  0x18   : > { %p151_p10 = scmp.eq.s32.totalorder %s920_s25, 3  ;;  %p157_p13 = scmp.eq.s32.totalorder %s563_s23, 3 }
  0x19   : > { %s963_s29 = scalar_select %p28_p7, %s853_s20, %s30_s27  }
  0x1a   : > { %p967_p11 = por %p44_p1, %p43_p9  ;;  %p971_p12 = por %p151_p10, %p37_p6 }
  0x1b   : > { %p39_p0 = por %p38_p8, %p37_p6  ;;  %s220_s7 = sand.u32 1, %s853_s20  }
  0x1c   : > { %p976_p2 = por %p157_p13, %p43_p9  ;;  %p618_p4 = scmp.lt.s32.totalorder %s857_s21, 4 }
  0x1d   : > { %s569_s9 = sshll.u32 %s220_s7, 3  ;;  %s570_s10 = sshll.u32 %s857_s21, 3 }
  0x1e   : > { %s228_s13 = scalar_lea.hbm %s1060_s0, %s570_s10  ;;  %s224_s15 = scalar_lea.vmem [#allocation2], %s569_s9 }
  0x1f   : > { %s230_s14 = sshll.u32 %s228_s13, 4  ;;  %s232_s16 = sshll.u32 %s224_s15, 4  ;;  %s231_s14 = int_to_ptr.hbm [resolvable:$true] %s230_s14  ;;  %s233_s16 = int_to_ptr.vmem [resolvable:$true] %s232_s16 }
  0x20   : > { %p985_p5 = pnand %p618_p4, %p39_p0  ;;  %s221_s22 = scalar_lea.sflag [#allocation3], %s220_s7 }
  0x21   : > { %s753_s23 = sshra.s32 %s231_s14, 4  ;;  %s760_s9 = scalar_lea.hbm %s1060_s0, 32  ;;  %s754_s23 = int_to_ptr.hbm [resolvable:$true] %s753_s23 }
  0x22   : > { %s755_s27 = scalar_lea.hbm %s754_s23, 8  ;;  %p757_p7 = pneg %p985_p5 }
  0x23   : > { %p756_p6 = scmp.ne.s32.totalorder %s754_s23, %s755_s27  ;;  %p761_p10 = scmp.lt.s32.totalorder %s754_s23, %s1060_s0 }
  0x24   : > { %p762_p13 = scmp.lt.s32.totalorder %s760_s9, %s755_s27 }
  0x25   : > { %p758_p8 = pnand %p757_p7, %p756_p6 }
  0x26   : > { %p763_p0 = por %p762_p13, %p761_p10 }
  0x27   : > { %p759_p9 = pneg %p758_p8 }
  0x29   : > { %p764_p4 = pnand %p763_p0, %p759_p9 }
  0x2b   : > { %767 = shalt.err (!%p764_p4)
}
  0x2c   : > { %610 = dma.hbm_to_vmem [thread:$0]  (!%p985_p5), %s231_s14, 128, %s233_s16, %s221_s22  }
  0x2d   : > { %241 = sbr.rel (%p925_p3) target bundleno = 356 (0x164), region = 40  ;;  %s1002_s7 = sand.u32 (!%p925_p3), 1, %s849_s19  }
  0x2e   : > { %s572_s13 = sshll.u32 (!%p925_p3), %s1002_s7, 3  ;;  %s244_s15 = scalar_lea.sflag (!%p925_p3), [#allocation3], %s1002_s7 }
  0x2f   : > { %s1008_s23 = scalar_lea.vmem (!%p925_p3), [#allocation2], %s572_s13 }
  0x32   : > { %828 = dma.done.wait (%p967_p11), %s244_s15, 128  }
  0x33   : > { %830 = vsyncadd (%p967_p11), %s244_s15, 4294967168 }
  0x34   : > { %832 = dma.done.wait (%p44_p1), [#allocation6], 4128  }
  0x35   : > { %834 = vsyncadd (%p44_p1), [#allocation6], 4294963168 }
  0x36   : > { %836 = dma.done.wait (%p44_p1), [#allocation9], 4096  }
  0x37   : > { %838 = vsyncadd (%p44_p1), [#allocation9], 4294963200  ;;  %v321_v0 = vld [vmem:[#allocation5 + $0xf0] sm:$0xff]  ;;  %v319_v1 = vld [vmem:[#allocation5 + $0xe0] sm:$0xff]  ;;  %s578_s26 = sshll.u32 %s920_s25, 3  ;;  %s289_s27 = scalar_lea.vmem [#allocation10], %s572_s13 }
  0x38   : > { %v322_v2 = vld [vmem:[#allocation5 + $0xf8] sm:$0xff]  ;;  %329 = vmatpush.msra.mxu0 %v321_v0  ;;  %v320_v3 = vld [vmem:[#allocation5 + $0xe8] sm:$0xff]  ;;  %v317_v4 = vld [vmem:[#allocation5 + $0xd0] sm:$0xff]  ;;  %s459_s22 = scalar_lea.hbm %s1065_s5, %s578_s26  ;;  %s461_s28 = sshll.u32 %s289_s27, 4  ;;  %s462_s28 = int_to_ptr.vmem [resolvable:$true] %s461_s28 }
  0x39   : > { %349 = vmatpush.msra.mxu1 %v322_v2  ;;  %v318_v5 = vld [vmem:[#allocation5 + $0xd8] sm:$0xff]  ;;  %v315_v6 = vld [vmem:[#allocation5 + $0xc0] sm:$0xff]  ;;  %v316_v7 = vld [vmem:[#allocation5 + $0xc8] sm:$0xff]  ;;  %s463_s10 = sshll.u32 %s459_s22, 4  ;;  %s449_s25 = scalar_lea.sflag [#allocation4], %s1002_s7  ;;  %s464_s10 = int_to_ptr.hbm [resolvable:$true] %s463_s10 }
  0x3a   : > { %330 = vmatpush.msra.mxu0 %v319_v1  ;;  %v313_v8 = vld [vmem:[#allocation5 + $0xb0] sm:$0xff]  ;;  %v314_v9 = vld [vmem:[#allocation5 + $0xb8] sm:$0xff]  ;;  %v311_v10 = vld [vmem:[#allocation5 + $0xa0] sm:$0xff]  ;;  %s797_s9 = sshra.s32 %s464_s10, 4  ;;  %s798_s9 = int_to_ptr.hbm [resolvable:$true] %s797_s9 }
  0x3b   : > { %350 = vmatpush.msra.mxu1 %v320_v3  ;;  %v312_v11 = vld [vmem:[#allocation5 + $0xa8] sm:$0xff]  ;;  %v309_v12 = vld [vmem:[#allocation5 + $0x90] sm:$0xff]  ;;  %v310_v13 = vld [vmem:[#allocation5 + $0x98] sm:$0xff]  ;;  %s799_s11 = scalar_lea.hbm %s798_s9, 8  ;;  %p804_p5 = scmp.lt.s32.totalorder %s798_s9, %s1065_s5 }
  0x3c   : > { %331 = vmatpush.msra.mxu0 %v317_v4  ;;  %v386_v14 = vld [vmem:[#allocation8 + $0x78] sm:$0xff]  ;;  %v385_v15 = vld [vmem:[#allocation8 + $0x70] sm:$0xff]  ;;  %v308_v18 = vld [vmem:[#allocation5 + $0x88] sm:$0xff]  ;;  %p800_p1 = scmp.ne.s32.totalorder %s798_s9, %s799_s11 }
  0x3d   : > { %351 = vmatpush.msra.mxu1 %v318_v5  ;;  %v402_v16 = vld [vmem:[#allocation8 + $0xf8] sm:$0xff]  ;;  %407 = vmatpush.msra.mxu2 %v386_v14  ;;  %v401_v19 = vld [vmem:[#allocation8 + $0xf0] sm:$0xff]  ;;  %v384_v20 = vld [vmem:[#allocation8 + $0x68] sm:$0xff] }
  0x3e   : > { %332 = vmatpush.msra.mxu0 %v315_v6  ;;  %v307_v17 = vld [vmem:[#allocation5 + $0x80] sm:$0xff]  ;;  %427 = vmatpush.msra.mxu3 %v402_v16  ;;  %v400_v21 = vld [vmem:[#allocation8 + $0xe8] sm:$0xff]  ;;  %v306_v23 = vld [vmem:[#allocation5 + $0x78] sm:$0xff]  ;;  %p801_p3 = pnand %p800_p1, %p971_p12 }
  0x3f   : > { %352 = vmatpush.msra.mxu1 %v316_v7  ;;  %v305_v22 = vld [vmem:[#allocation5 + $0x70] sm:$0xff]  ;;  %408 = vmatpush.msra.mxu2 %v385_v15  ;;  %v383_v24 = vld [vmem:[#allocation8 + $0x60] sm:$0xff]  ;;  %v382_v28 = vld [vmem:[#allocation8 + $0x58] sm:$0xff] }
  0x40   : > { %333 = vmatpush.msra.mxu0 %v313_v8  ;;  %428 = vmatpush.msra.mxu3 %v401_v19  ;;  %v399_v25 = vld [vmem:[#allocation8 + $0xe0] sm:$0xff]  ;;  %v398_v29 = vld [vmem:[#allocation8 + $0xd8] sm:$0xff]  ;;  %v301_v30 = vld [vmem:[#allocation5 + $0x50] sm:$0xff]  ;;  %p802_p11 = pneg %p801_p3 }
  0x41   : > { %353 = vmatpush.msra.mxu1 %v314_v9  ;;  %v303_v26 = vld [vmem:[#allocation5 + $0x60] sm:$0xff]  ;;  %v304_v27 = vld [vmem:[#allocation5 + $0x68] sm:$0xff]  ;;  %409 = vmatpush.msra.mxu2 %v384_v20  ;;  %v302_v31 = vld [vmem:[#allocation5 + $0x58] sm:$0xff] }
  0x42   : > { %334 = vmatpush.msra.mxu0 %v311_v10  ;;  %429 = vmatpush.msra.mxu3 %v400_v21  ;;  %v381_v32 = vld [vmem:[#allocation8 + $0x50] sm:$0xff]  ;;  %v299_v34 = vld [vmem:[#allocation5 + $0x40] sm:$0xff]  ;;  %v300_v35 = vld [vmem:[#allocation5 + $0x48] sm:$0xff] }
  0x43   : > { %354 = vmatpush.msra.mxu1 %v312_v11  ;;  %410 = vmatpush.msra.mxu2 %v383_v24  ;;  %v397_v33 = vld [vmem:[#allocation8 + $0xd0] sm:$0xff]  ;;  %v380_v36 = vld [vmem:[#allocation8 + $0x48] sm:$0xff]  ;;  %v379_v40 = vld [vmem:[#allocation8 + $0x40] sm:$0xff] }
  0x44   : > { %335 = vmatpush.msra.mxu0 %v309_v12  ;;  %430 = vmatpush.msra.mxu3 %v399_v25  ;;  %v396_v37 = vld [vmem:[#allocation8 + $0xc8] sm:$0xff]  ;;  %v298_v39 = vld [vmem:[#allocation5 + $0x38] sm:$0xff]  ;;  %v395_v41 = vld [vmem:[#allocation8 + $0xc0] sm:$0xff] }
  0x45   : > { %355 = vmatpush.msra.mxu1 %v310_v13  ;;  %411 = vmatpush.msra.mxu2 %v382_v28  ;;  %v297_v38 = vld [vmem:[#allocation5 + $0x30] sm:$0xff]  ;;  %v295_v42 = vld [vmem:[#allocation5 + $0x20] sm:$0xff]  ;;  %v296_v43 = vld [vmem:[#allocation5 + $0x28] sm:$0xff] }
  0x46   : > { %336 = vmatpush.msra.mxu0 %v307_v17  ;;  %431 = vmatpush.msra.mxu3 %v398_v29  ;;  %v378_v44 = vld [vmem:[#allocation8 + $0x38] sm:$0xff]  ;;  %v293_v46 = vld [vmem:[#allocation5 + $0x10] sm:$0xff]  ;;  %v292_v51 = vld [vmem:[#allocation5 + $0x8] sm:$0xff] }
  0x47   : > { %356 = vmatpush.msra.mxu1 %v308_v18  ;;  %412 = vmatpush.msra.mxu2 %v381_v32  ;;  %v394_v45 = vld [vmem:[#allocation8 + $0xb8] sm:$0xff]  ;;  %v377_v48 = vld [vmem:[#allocation8 + $0x30] sm:$0xff]  ;;  %v376_v53 = vld [vmem:[#allocation8 + $0x28] sm:$0xff] }
  0x48   : > { %337 = vmatpush.msra.mxu0 %v305_v22  ;;  %432 = vmatpush.msra.mxu3 %v397_v33  ;;  %v294_v47 = vld [vmem:[#allocation5 + $0x18] sm:$0xff]  ;;  %v291_v50 = vld [vmem:[#allocation5] sm:$0xff]  ;;  %v392_v54 = vld [vmem:[#allocation8 + $0xa8] sm:$0xff] }
  0x49   : > { %357 = vmatpush.msra.mxu1 %v306_v23  ;;  %413 = vmatpush.msra.mxu2 %v380_v36  ;;  %v393_v49 = vld [vmem:[#allocation8 + $0xb0] sm:$0xff]  ;;  %v375_v55 = vld [vmem:[#allocation8 + $0x20] sm:$0xff]  ;;  %v374_v57 = vld [vmem:[#allocation8 + $0x18] sm:$0xff] }
  0x4a   : > { %338 = vmatpush.msra.mxu0 %v303_v26  ;;  %433 = vmatpush.msra.mxu3 %v396_v37  ;;  %v290_v52 = vld [vmem:[%s1008_s23] sm:$0xff]  ;;  %v391_v56 = vld [vmem:[#allocation8 + $0xa0] sm:$0xff]  ;;  %v323_v1 = vld [vmem:[#allocation7] sm:$0x3]  ;;  %s803_s23 = scalar_lea.hbm %s1065_s5, 32 }
  0x4b   : > { %358 = vmatpush.msra.mxu1 %v304_v27  ;;  %414 = vmatpush.msra.mxu2 %v379_v40  ;;  %v373_v58 = vld [vmem:[#allocation8 + $0x10] sm:$0xff]  ;;  %v390_v59 = vld [vmem:[#allocation8 + $0x98] sm:$0xff]  ;;  %v372_v60 = vld [vmem:[#allocation8 + $0x8] sm:$0xff]  ;;  %v325_v2 = vperm.slane %v323_v1, 0  ;;  %v326_v3 = vperm.slane %v323_v1, 1  ;;  %p805_p6 = scmp.lt.s32.totalorder %s803_s23, %s799_s11 }
  0x4c   : > { %339 = vmatpush.msra.mxu0 %v301_v30  ;;  %434 = vmatpush.msra.mxu3 %v395_v41  ;;  %v389_v61 = vld [vmem:[#allocation8 + $0x90] sm:$0xff]  ;;  %v371_v62 = vld [vmem:[#allocation8] sm:$0xff]  ;;  %v388_v63 = vld [vmem:[#allocation8 + $0x88] sm:$0xff] }
  0x4d   : > { %359 = vmatpush.msra.mxu1 %v302_v31  ;;  %415 = vmatpush.msra.mxu2 %v378_v44  ;;  %v387_v0 = vld [vmem:[#allocation8 + $0x80] sm:$0xff]  ;;  %v662_v10 = vld [vmem:[%s1064_s4] ss:$0 sm:$0xff]  ;;  %p806_p7 = por %p805_p6, %p804_p5 }
  0x4e   : > { %340 = vmatpush.msra.mxu0 %v299_v34  ;;  %435 = vmatpush.msra.mxu3 %v394_v45 }
  0x4f   : > { %360 = vmatpush.msra.mxu1 %v300_v35  ;;  %416 = vmatpush.msra.mxu2 %v377_v48  ;;  %p807_p8 = pnand %p806_p7, %p802_p11 }
  0x50   : > { %341 = vmatpush.msra.mxu0 %v297_v38  ;;  %436 = vmatpush.msra.mxu3 %v393_v49 }
  0x51   : > { %361 = vmatpush.msra.mxu1 %v298_v39  ;;  %417 = vmatpush.msra.mxu2 %v376_v53 }
  0x52   : > { %342 = vmatpush.msra.mxu0 %v295_v42  ;;  %437 = vmatpush.msra.mxu3 %v392_v54 }
  0x53   : > { %362 = vmatpush.msra.mxu1 %v296_v43  ;;  %418 = vmatpush.msra.mxu2 %v375_v55 }
  0x54   : > { %343 = vmatpush.msra.mxu0 %v293_v46  ;;  %438 = vmatpush.msra.mxu3 %v391_v56 }
  0x55   : > { %363 = vmatpush.msra.mxu1 %v294_v47  ;;  %419 = vmatpush.msra.mxu2 %v374_v57 }
  0x56   : > { %344 = vmatpush.msra.mxu0 %v291_v50  ;;  %439 = vmatpush.msra.mxu3 %v390_v59 }
  0x57   : > { %364 = vmatpush.msra.mxu1 %v292_v51  ;;  %345 = vmatmul.f32.vlgmr.msra.gmra.mxu0 %v290_v52 }
  0x58   : > { %365 = vmatmul.f32.vlgmr.msra.gmra.mxu1 %v290_v52  ;;  %420 = vmatpush.msra.mxu2 %v373_v58 }
  0x59   : > { %440 = vmatpush.msra.mxu3 %v389_v61 }
  0x5a   : > { %421 = vmatpush.msra.mxu2 %v372_v60 }
  0x5b   : > { %441 = vmatpush.msra.mxu3 %v388_v63 }
  0x5c   : > { %422 = vmatpush.msra.mxu2 %v371_v62 }
  0x5d   : > { %442 = vmatpush.msra.mxu3 %v387_v0 }
  0xd4   : > { %v346_v4 = vpop.f32.mrf.mxu0 }
  0xd5   : > { %v366_v5 = vpop.f32.mrf.mxu1  ;;  %v347_v6 = vadd.f32 %v346_v4, %v325_v2 }
  0xd6   : > { %v367_v7 = vadd.f32 %v366_v5, %v326_v3 }
  0xd7   : > { %v369_v8 = vmax.f32 %v347_v6, 0.0 }
  0xd8   : > { %v370_v9 = vmax.f32 %v367_v7, 0.0 }
  0xd9   : > { %423 = vmatmul.f32.vlgmr.msra.gmra.mxu2 %v369_v8 }
  0xda   : > { %443 = vmatmul.f32.vlgmr.msra.gmra.mxu3 %v370_v9 }
 0x15c   : > { %v424_v11 = vpop.f32.mrf.mxu2 }
 0x15d   : > { %v444_v12 = vpop.f32.mrf.mxu3  ;;  %v425_v13 = vadd.f32 %v662_v10, %v424_v11 }
 0x15f   : > { %v445_v14 = vadd.f32 %v444_v12, %v425_v13 }
 0x161   : > { %447 = vst [vmem:[%s289_s27] sm:$0xff] %v445_v14 }
 0x162   : > { %810 = shalt.err (!%p807_p8)
}
 0x163   : > { %595 = dma.vmem_to_hbm [thread:$0]  (%p971_p12), %s462_s28, 128, %s464_s10, %s449_s25  }
 0x164 PF: > { %p622_p9 = scmp.ge.s32.totalorder %s857_s21, 2  ;;  %s475_s7 = sand.u32 1, %s845_s18  }
 0x165   : > { %s476_s30 = scalar_lea.sflag [#allocation4], %s475_s7 }
 0x166   : > { %p612_p10 = pnand %p622_p9, %p976_p2 }
 0x168   : > { %p613_p13 = pneg %p612_p10 }
 0x16a   : > { %840 = dma.done.wait (%p613_p13), %s476_s30, 128  }
 0x16b   : > { %842 = vsyncadd (%p613_p13), %s476_s30, 4294967168  ;;  %p20_p0 = scmp.ge.s32.totalorder %s951_s24, 6   ;;  %s1072_s18 = smov %s849_s19 }
 0x16c   : > { %s1073_s19 = smov %s853_s20  ;;  %s1074_s20 = smov %s963_s29 }
 0x16d   : > { %s1075_s21 = smov %s951_s24  ;;  %22 = sbr.rel (!%p20_p0) target bundleno = 7 (0x7), region = 97 }
 0x172   :  { %482 = vsyncpa [#allocation3], 1 }
 0x173   :  { %484 = vsyncpa [#allocation3 + $0x1], 1 }
 0x174   :  { %485 = vsyncpa [#allocation6], 1 }
 0x175   :  { %486 = vsyncpa [#allocation9], 1 }
 0x176   :  { %487 = vsyncpa [#allocation4], 1 }
 0x177   :  { %489 = vsyncpa [#allocation4 + $0x1], 1 }

</bundles_post_ra>
